<compile_context>
chip_gen: v7x
topology: tpu7x:2x2x1
jax: 0.10.0
libtpu: 0.0.40
codegen_flags: <defaults>
</compile_context>

<pallas_src>
import functools
import math

import jax
import jax.numpy as jnp
from jax import lax
from jax.experimental import pallas as pl
from jax.experimental.pallas import tpu as pltpu

# Raise this when using very large row/key tiles (v5e scoped default is 16 MiB).
_VMEM_LIMIT = 32 * 1024 * 1024


def _pick_tile(n, target, quantum):
    """Largest multiple of `quantum` <= target that divides n; else full n."""
    if n <= target:
        return n
    t = (target // quantum) * quantum
    while t >= quantum:
        if n % t == 0:
            return t
        t -= quantum
    return n


# ---------------------------------------------------------------------------
# Kernel A: fused multi-head projection  h = x @ W_cat   (row-tiled)
# ---------------------------------------------------------------------------
def proj_kernel(x_ref, w_ref, out_ref, *, precise):
    x = x_ref[...]            # [TQ, F]
    w = w_ref[...]            # [F, Hout]
    if not precise:           # bf16 MXU operands, f32 accumulation (v6e/v7x)
        x = x.astype(jnp.bfloat16)
        w = w.astype(jnp.bfloat16)
    out_ref[...] = jnp.dot(x, w, preferred_element_type=jnp.float32)


def gat_project(x, w, *, precise=True, tq=None):
    N, F = x.shape
    Hout = w.shape[1]
    if tq is None:
        tq = _pick_tile(N, 512, 32)
    kernel = functools.partial(proj_kernel, precise=precise)
    return pl.pallas_call(
        kernel,
        out_shape=jax.ShapeDtypeStruct((N, Hout), jnp.float32),
        grid_spec=pltpu.PrefetchScalarGridSpec(
            num_scalar_prefetch=0,
            grid=(N // tq,),
            in_specs=[
                pl.BlockSpec((tq, F), lambda i: (i, 0)),     # x row tile
                pl.BlockSpec((F, Hout), lambda i: (0, 0)),   # all-head weights
            ],
            out_specs=pl.BlockSpec((tq, Hout), lambda i: (i, 0)),
        ),
        compiler_params=pltpu.CompilerParams(
            dimension_semantics=("parallel",),
            vmem_limit_bytes=_VMEM_LIMIT),
    )(x, w)


# ---------------------------------------------------------------------------
# Kernel B: fused multi-head graph attention, (row, key) tiles, online softmax
# ---------------------------------------------------------------------------
def attn_kernel(hq_ref, hk_ref, a_ref, adj_ref, out_ref,
                m_sc, l_sc, acc_sc, *,
                n_heads, head_dim, alpha, mode, out_pad, precise):
    H = head_dim
    k_idx = pl.program_id(1)

    @pl.when(k_idx == 0)
    def _init():
        m_sc[...] = jnp.full(m_sc.shape, -jnp.inf, m_sc.dtype)
        l_sc[...] = jnp.zeros(l_sc.shape, l_sc.dtype)
        acc_sc[...] = jnp.zeros(acc_sc.shape, acc_sc.dtype)

    adj_ok = adj_ref[...] > 0          # int8 {0,1} mask tile, shared by heads
    hq = hq_ref[...]                   # [TQ, n_heads*H]  (query rows)
    hk = hk_ref[...]                   # [TK, n_heads*H]  (key rows)
    dn = (((1,), (1,)), ((), ()))      # contract on last dims

    for hd in range(n_heads):
        hq_h = hq[:, hd * H:(hd + 1) * H]                # [TQ, H]
        hk_h = hk[:, hd * H:(hd + 1) * H]                # [TK, H]
        a_h = a_ref[hd]                                  # [2, H] (a1; a2)

        # Single h @ a.T per side (instead of two rank-1 matmuls).
        # NOTE: fq is cheap (TQ*2*H MACs) so it is simply recomputed per key block.
        fq = lax.dot_general(hq_h, a_h, dn,
                             preferred_element_type=jnp.float32)   # [TQ, 2]
        fk = lax.dot_general(a_h, hk_h, dn,
                             preferred_element_type=jnp.float32)   # [2, TK]
        e = fq[:, 0:1] + fk[1:2, :]                                # [TQ, TK]
        e = jnp.where(e > 0, e, alpha * e)               # LeakyReLU(alpha)
        # -1e12 mask == torch `zero_vec` trick; rows with no neighbours end up
        # with uniform attention over all nodes, exactly as in the reference.
        e = jnp.where(adj_ok, e, -1.0e12)

        # Online softmax accumulation across key blocks.
        m_prev = m_sc[:, hd:hd + 1]
        l_prev = l_sc[:, hd:hd + 1]
        m_new = jnp.maximum(m_prev, jnp.max(e, axis=1, keepdims=True))
        scale = jnp.exp(m_prev - m_new)
        p = jnp.exp(e - m_new)                                     # [TQ, TK]
        m_sc[:, hd:hd + 1] = m_new
        l_sc[:, hd:hd + 1] = scale * l_prev + jnp.sum(p, axis=1, keepdims=True)
        if precise:
            pv = jnp.dot(p, hk_h, preferred_element_type=jnp.float32)
        else:   # bf16 MXU operands, f32 accumulation (v6e/v7x fast path)
            pv = jnp.dot(p.astype(jnp.bfloat16), hk_h.astype(jnp.bfloat16),
                         preferred_element_type=jnp.float32)
        acc_sc[:, hd * H:(hd + 1) * H] = (
            scale * acc_sc[:, hd * H:(hd + 1) * H] + pv)

    @pl.when(k_idx == pl.num_programs(1) - 1)
    def _finalize():
        parts = []
        for hd in range(n_heads):
            inv = pl.reciprocal(l_sc[:, hd:hd + 1], approx=not precise)
            parts.append(acc_sc[:, hd * H:(hd + 1) * H] * inv)
        res = parts[0] if n_heads == 1 else jnp.concatenate(parts, axis=-1)
        if mode in ("elu", "final"):
            res = jnp.where(res > 0, res, jnp.exp(res) - 1.0)      # ELU
        if mode == "final":                                        # log_softmax(dim=1)
            mx = jnp.max(res, axis=1, keepdims=True)
            lse = jnp.log(jnp.sum(jnp.exp(res - mx), axis=1, keepdims=True)) + mx
            res = res - lse
        if out_pad > 0:   # lane-dense padded store; wrapper slices the pad off
            res = jnp.concatenate(
                [res, jnp.zeros((res.shape[0], out_pad), jnp.float32)], axis=-1)
        out_ref[...] = res


def gat_attention(h, a_stack, adj, *, n_heads, head_dim, alpha, mode,
                  precise=True, out_width=None, tq=None, tk=None):
    """All heads of one GAT attention stage in a single pallas_call."""
    N, width = h.shape
    assert width == n_heads * head_dim
    if out_width is None:
        out_width = width
    out_pad = out_width - width
    if tq is None:
        tq = _pick_tile(N, 512, 32)     # row tile (multiple of 32: int8 adj rows)
    if tk is None:
        tk = _pick_tile(N, 512, 128)    # key tile (multiple of 128 lanes)
    kernel = functools.partial(
        attn_kernel, n_heads=n_heads, head_dim=head_dim, alpha=alpha,
        mode=mode, out_pad=out_pad, precise=precise)
    return pl.pallas_call(
        kernel,
        out_shape=jax.ShapeDtypeStruct((N, out_width), jnp.float32),
        grid_spec=pltpu.PrefetchScalarGridSpec(
            num_scalar_prefetch=0,
            grid=(N // tq, N // tk),
            in_specs=[
                pl.BlockSpec((tq, width), lambda i, k: (i, 0)),     # h, query rows
                pl.BlockSpec((tk, width), lambda i, k: (k, 0)),     # h, key rows
                pl.BlockSpec((n_heads, 2, head_dim), lambda i, k: (0, 0, 0)),
                pl.BlockSpec((tq, tk), lambda i, k: (i, k)),        # adj tile (int8)
            ],
            out_specs=pl.BlockSpec((tq, out_width), lambda i, k: (i, 0)),
            scratch_shapes=[
                pltpu.VMEM((tq, n_heads), jnp.float32),   # running max  (per head)
                pltpu.VMEM((tq, n_heads), jnp.float32),   # running denom
                pltpu.VMEM((tq, width), jnp.float32),     # running numerator
            ]),
        compiler_params=pltpu.CompilerParams(
            dimension_semantics=("parallel", "arbitrary"),
            vmem_limit_bytes=_VMEM_LIMIT),
    )(h, h, a_stack, adj)


# ---------------------------------------------------------------------------
# Parameter init (xavier_uniform, gain=1.414 — same as the PyTorch module)
# ---------------------------------------------------------------------------
def _xavier_uniform(key, shape, gain=1.414):
    fan_in, fan_out = shape[0], shape[1]
    limit = gain * math.sqrt(6.0 / (fan_in + fan_out))
    return jax.random.uniform(key, shape, jnp.float32, -limit, limit)


def init_gal_params(key, in_features, out_features):
    kw, ka = jax.random.split(key)
    W = _xavier_uniform(kw, (in_features, out_features))
    # PyTorch `a` has shape (2*out_features, 1); stored as [2, out_features]:
    # row 0 == a[:out_features, 0], row 1 == a[out_features:, 0]
    a_col = _xavier_uniform(ka, (2 * out_features, 1))
    a = a_col.reshape(2, out_features)
    return W, a


def init_gat_params(key, n_feat, n_hid, n_class, n_heads):
    keys = jax.random.split(key, n_heads + 1)
    heads = [init_gal_params(keys[i], n_feat, n_hid) for i in range(n_heads)]
    out = init_gal_params(keys[-1], n_hid * n_heads, n_class)
    return {"heads": heads, "out": out}


# ---------------------------------------------------------------------------
# to_adj (glue, plain JAX) — mirrors GAT.to_adj; int8 {0,1} to cut HBM traffic
# ---------------------------------------------------------------------------
def to_adj(edge_index, node_num):
    Nt = edge_index.shape[0]
    i = jnp.arange(Nt)[:, None]                     # [Nt, 1]
    offset = node_num * (i // node_num)             # 0 when i // node_num == 0
    j_ind = edge_index + offset                     # [Nt, K]
    valid = (edge_index != -1)
    onehot = jax.nn.one_hot(jnp.where(valid, j_ind, 0), Nt, dtype=jnp.float32)
    onehot = onehot * valid[..., None].astype(jnp.float32)
    return (jnp.sum(onehot, axis=1) > 0).astype(jnp.int8)   # [Nt, Nt] {0,1}


# ---------------------------------------------------------------------------
# Full GAT forward
# ---------------------------------------------------------------------------
def gat_forward(params, x, edge_index, *, node_num, alpha,
                precise=True, tq=None, tk=None):
    adj = to_adj(edge_index, node_num)      # built once, shared by all layers
    # TODO(synk): dropout on x / attention is identity (inference-mode forward)

    heads = params["heads"]
    n_heads = len(heads)
    n_hid = heads[0][0].shape[1]
    W_cat = jnp.concatenate([W for (W, _) in heads], axis=1)   # [F, n_heads*n_hid]
    a_stack = jnp.stack([a for (_, a) in heads], axis=0)       # [n_heads, 2, n_hid]

    h1 = gat_project(x, W_cat, precise=precise, tq=tq)         # [N, n_heads*n_hid]
    x1 = gat_attention(h1, a_stack, adj, n_heads=n_heads, head_dim=n_hid,
                       alpha=alpha, mode="elu", precise=precise, tq=tq, tk=tk)

    W_out, a_out = params["out"]
    n_class = W_out.shape[1]
    h2 = gat_project(x1, W_out, precise=precise, tq=tq)        # [N, n_class]
    out_w = max(n_class, 128)                                  # lane-dense store
    out = gat_attention(h2, a_out[None, ...], adj, n_heads=1, head_dim=n_class,
                        alpha=alpha, mode="final", precise=precise,
                        out_width=out_w, tq=tq, tk=tk)
    return out[:, :n_class]


# ---------------------------------------------------------------------------
# Pure-JAX reference (for sanity checks)
# ---------------------------------------------------------------------------
def _gal_ref(x, W, a, adj, alpha, mode):
    h = x @ W
    f1 = h @ a[0]
    f2 = h @ a[1]
    e = f1[:, None] + f2[None, :]
    e = jnp.where(e > 0, e, alpha * e)
    att = jnp.where(adj > 0, e, -1.0e12)
    att = jax.nn.softmax(att, axis=1)
    hp = att @ h
    if mode == "elu":
        hp = jax.nn.elu(hp)
    elif mode == "final":
        hp = jax.nn.log_softmax(jax.nn.elu(hp), axis=1)
    return hp


def _gat_ref(params, x, edge_index, node_num, alpha):
    adj = to_adj(edge_index, node_num)
    xh = jnp.concatenate(
        [_gal_ref(x, W, a, adj, alpha, "elu") for (W, a) in params["heads"]],
        axis=1)
    W_out, a_out = params["out"]
    return _gal_ref(xh, W_out, a_out, adj, alpha, "final")


# ---------------------------------------------------------------------------
if __name__ == "__main__":
    n_feat, n_hid, n_class = 16, 32, 8
    n_heads = 2
    alpha = 0.2

    key = jax.random.PRNGKey(0)
    k_par, k_x, k_e = jax.random.split(key, 3)
    params = init_gat_params(k_par, n_feat, n_hid, n_class, n_heads)

    # --- small shapes consistent with the module: node_num=4, n_thr=2 -> N=8
    node_num, n_thr, max_deg = 4, 2, 3
    N = node_num * n_thr
    x = jax.random.normal(k_x, (N, n_feat), dtype=jnp.float32)
    edge_index = jax.random.randint(k_e, (N, max_deg), -1, node_num,
                                    dtype=jnp.int32)

    ref = _gat_ref(params, x, edge_index, node_num, alpha)

    out = gat_forward(params, x, edge_index, node_num=node_num, alpha=alpha,
                      precise=True)
    out = jax.block_until_ready(out)
    assert out.shape == (N, n_class)
    assert jnp.allclose(out, ref, rtol=1e-4, atol=1e-4)

    # fast path: bf16 MXU operands + approx reciprocal (v6e/v7x recommendation)
    out_fast = gat_forward(params, x, edge_index, node_num=node_num, alpha=alpha,
                           precise=False)
    out_fast = jax.block_until_ready(out_fast)
    assert jnp.allclose(out_fast, ref, rtol=1e-1, atol=1e-1)

    # --- larger graph to exercise multi-block row/key tiling + online softmax
    node_num2, n_thr2 = 32, 8
    N2 = node_num2 * n_thr2                       # 256 nodes -> grid (4, 2)
    k_x2, k_e2 = jax.random.split(jax.random.PRNGKey(1))
    x2 = jax.random.normal(k_x2, (N2, n_feat), dtype=jnp.float32)
    edge_index2 = jax.random.randint(k_e2, (N2, max_deg), -1, node_num2,
                                     dtype=jnp.int32)
    ref2 = _gat_ref(params, x2, edge_index2, node_num2, alpha)
    out2 = gat_forward(params, x2, edge_index2, node_num=node_num2, alpha=alpha,
                       precise=True, tq=64, tk=128)
    out2 = jax.block_until_ready(out2)
    assert out2.shape == (N2, n_class)
    assert jnp.allclose(out2, ref2, rtol=2e-3, atol=2e-3)

    print("KERNEL_OK")
</pallas_src>

<mosaic_0001>
module attributes {stable_mosaic.version = 11 : i64} {
  func.func @proj_kernel(%arg0: i32, %arg1: memref<8x16xf32, #tpu.memory_space<vmem>>, %arg2: memref<16x64xf32, #tpu.memory_space<vmem>>, %arg3: memref<8x64xf32, #tpu.memory_space<vmem>>) attributes {dimension_semantics = [#tpu.dimension_semantics<parallel>], iteration_bounds = array<i64: 1>, scalar_prefetch = 0 : i64, scratch_operands = 0 : i64, tpu.core_type = #tpu.core_type<tc>, window_params = [{transform_indices = @transform_0, window_bounds = array<i64: 8, 16>}, {pipeline_mode = #tpu.pipeline_mode<synchronous>, transform_indices = @transform_1, window_bounds = array<i64: 16, 64>}, {transform_indices = @transform_2, window_bounds = array<i64: 8, 64>}]} {
    %c0 = arith.constant 0 : index
    %c0_0 = arith.constant 0 : index
    %0 = vector.load %arg1[%c0, %c0_0] : memref<8x16xf32, #tpu.memory_space<vmem>>, vector<8x16xf32>
    %c0_1 = arith.constant 0 : index
    %c0_2 = arith.constant 0 : index
    %1 = vector.load %arg2[%c0_1, %c0_2] : memref<16x64xf32, #tpu.memory_space<vmem>>, vector<16x64xf32>
    %cst = arith.constant dense<0.000000e+00> : vector<8x64xf32>
    %2 = tpu.matmul %0, %1, %cst {dimension_numbers = #tpu.dot_dimension_numbers<[1], [0], [0], [1], [0, 0, 1, 1], [], []>} : vector<8x16xf32>, vector<16x64xf32>, vector<8x64xf32> -> vector<8x64xf32>
    %c0_3 = arith.constant 0 : index
    %c0_4 = arith.constant 0 : index
    %3 = vector.load %arg3[%c0_3, %c0_4] : memref<8x64xf32, #tpu.memory_space<vmem>>, vector<8x64xf32>
    tpu.vector_store %arg3[%c0_3, %c0_4], %2 {strides = array<i32>} : memref<8x64xf32, #tpu.memory_space<vmem>>, vector<8x64xf32>,
    return
  }
  func.func @transform_0(%arg0: i32) -> (i32, i32) {
    %c0_i32 = arith.constant 0 : i32
    %c0_i32_0 = arith.constant 0 : i32
    return %arg0, %c0_i32 : i32, i32
  }
  func.func @transform_1(%arg0: i32) -> (i32, i32) {
    %c0_i32 = arith.constant 0 : i32
    %c0_i32_0 = arith.constant 0 : i32
    %c0_i32_1 = arith.constant 0 : i32
    return %c0_i32, %c0_i32_0 : i32, i32
  }
  func.func @transform_2(%arg0: i32) -> (i32, i32) {
    %c0_i32 = arith.constant 0 : i32
    %c0_i32_0 = arith.constant 0 : i32
    return %arg0, %c0_i32 : i32, i32
  }
}

</mosaic_0001>

<bundles_post_ra>
// kernel: tpu_custom_call.1
= control target key start
LH: loop header
LB: loop body
LE: loop exit
PB: predicated region body
PF: predicated region fallthrough
CT: control target
= control target key end

     0   :  { %7 = vsyncpa [#allocation3], 0  ;;  %s293_s0 = inlined_call_operand.hbm [shape: f32[8,16], index: 0, kind: input, shape index: {}]   ;;  %s294_s1 = inlined_call_operand.hbm [shape: f32[16,64], index: 1, kind: input, shape index: {}]   ;;  %s295_s2 = inlined_call_operand.hbm [shape: f32[8,64], index: 2, kind: output, shape index: {}]  }
   0x1   :  { %8 = vsyncpa [#allocation6], 0 }
   0x2   :  { %9 = vsyncpa [#allocation4], 0  ;;  %s227_s9 = smov [#allocation2]   ;;  %s228_s11 = smov [#allocation5]  }
   0x3   :  { %s16_s10 = sshll.u32 %s227_s9, 4  ;;  %s25_s12 = sshll.u32 %s228_s11, 4  ;;  %s17_s10 = int_to_ptr.vmem [resolvable:$true] %s16_s10  ;;  %s250_s12 = int_to_ptr.vmem [resolvable:$true] %s25_s12 }
   0x4   :  { %s155_s15 = scalar_lea.hbm %s293_s0, 128 }
   0x5   :  { %p156_p0 = scmp.ne.s32.totalorder %s293_s0, %s155_s15  ;;  %p159_p1 = scmp.lt.u32.totalorder %s155_s15, %s293_s0 }
   0x7   :  { %p161_p2 = pnand %p159_p1, %p156_p0 }
   0x9   :  { %164 = shalt.err (!%p161_p2)
}
   0xa   :  { %s165_s20 = scalar_lea.vmem %s17_s10, 128  ;;  %p170_p4 = scmp.lt.s32.totalorder %s17_s10, %s17_s10 }
   0xb   :  { %p166_p3 = scmp.ne.s32.totalorder %s17_s10, %s165_s20  ;;  %p171_p5 = scmp.lt.s32.totalorder %s165_s20, %s165_s20 }
   0xd   :  { %p172_p6 = por %p171_p5, %p170_p4 }
   0xf   :  { %p173_p7 = pnand %p172_p6, %p166_p3 }
  0x11   :  { %176 = shalt.err (!%p173_p7)
}
  0x12   :  { %19 = dma.hbm_to_vmem [thread:$0]  %s293_s0, 128, %s17_s10, [#allocation3]  }
  0x13   :  { %s177_s25 = scalar_lea.hbm %s294_s1, 256 }
  0x14   :  { %p178_p8 = scmp.ne.s32.totalorder %s294_s1, %s177_s25  ;;  %p181_p9 = scmp.lt.u32.totalorder %s177_s25, %s294_s1 }
  0x16   :  { %p183_p10 = pnand %p181_p9, %p178_p8 }
  0x18   :  { %186 = shalt.err (!%p183_p10)
}
  0x19   :  { %s187_s30 = scalar_lea.vmem %s250_s12, 256  ;;  %p192_p12 = scmp.lt.s32.totalorder %s250_s12, %s250_s12 }
  0x1a   :  { %p188_p11 = scmp.ne.s32.totalorder %s250_s12, %s187_s30  ;;  %p193_p13 = scmp.lt.s32.totalorder %s187_s30, %s187_s30 }
  0x1c   :  { %p194_p0 = por %p193_p13, %p192_p12 }
  0x1e   :  { %p195_p1 = pnand %p194_p0, %p188_p11 }
  0x20   :  { %198 = shalt.err (!%p195_p1)
}
  0x21   :  { %s229_s0 = smov 128   ;;  %s230_s3 = smov 8  }
  0x22   :  { %31 = dma.hbm_to_vmem [thread:$0]  %s294_s1, 256, %s250_s12, [#allocation6], %s229_s0, %s229_s0, %s230_s3  }
  0x23   :  { %221 = dma.done.wait [#allocation3], 128  }
  0x24   :  { %222 = vsyncadd [#allocation3], 4294967168 }
  0x25   :  { %223 = dma.done.wait [#allocation6], 256  }
  0x26   :  { %224 = vsyncadd [#allocation6], 4294967040  ;;  %v231_v0 = vmov 0.0|0.0   ;;  %vm232_vm0 = vmmov 0   ;;  %v233_v1 = vmov 0.0   ;;  %v39_v2 = vld [vmem:[#allocation5] sm:$0xff] }
  0x27   :  { %144 = vmatprep.subr.bf16.mxu0 %v231_v0  ;;  %141 = vmatprep.mubr.msk.f32.mxu0 %vm232_vm0, %v233_v1  ;;  %v40_v3 = vld [vmem:[#allocation5 + $0x8] sm:$0xff]  ;;  %v38_v5 = vld [vmem:[#allocation2] sm:$0xff]  ;;  %vm41_vm1 = vcmask 130048   ;;  %s234_s6 = smov [#allocation7]   ;;  %vm115_vm2 = vcmask 523264  }
  0x28   :  { %v145_v4 = vpack.c.bf16 %v40_v3, %v39_v2  ;;  %s123_s7 = sshll.u32 %s234_s6, 4  ;;  %s124_s7 = int_to_ptr.vmem [resolvable:$true] %s123_s7 }
  0x29   :  { %s199_s1 = scalar_lea.vmem %s124_s7, 128  ;;  %p204_p3 = scmp.lt.s32.totalorder %s124_s7, %s124_s7 }
  0x2a   :  { %146 = vmatpush3.bf16.msra.mxu0 %v145_v4  ;;  %p200_p2 = scmp.ne.s32.totalorder %s124_s7, %s199_s1  ;;  %p205_p4 = scmp.lt.s32.totalorder %s199_s1, %s199_s1 }
  0x2c   :  { %p206_p5 = por %p205_p4, %p204_p3 }
  0x2d   :  { %142 = vmatmul.mubr.msk.f32.vlgmr.msra.gmra.mrb[0].mxu0 %vm41_vm1, %v38_v5 }
  0x2e   :  { %p207_p6 = pnand %p206_p5, %p200_p2 }
 0x100   :  { %v111_v6 = vpop.f32.mrb[0].mxu0 }
 0x101   :  { %v143_v7 = vpop.f32.mrb[1].mxu0  ;;  %116 = vst.msk [vmem:[#allocation7] sm:$0xff] %vm115_vm2, %v111_v6 }
 0x102   :  { %210 = shalt.err (!%p207_p6)
}
 0x103   :  { %s211_s10 = scalar_lea.hbm %s295_s2, 128 }
 0x104   :  { %p212_p7 = scmp.ne.s32.totalorder %s295_s2, %s211_s10  ;;  %p215_p8 = scmp.lt.u32.totalorder %s211_s10, %s295_s2 }
 0x106   :  { %p217_p9 = pnand %p215_p8, %p212_p7 }
 0x108   :  { %220 = shalt.err (!%p217_p9)
}
 0x109   :  { %126 = dma.vmem_to_hbm [thread:$0]  %s124_s7, 128, %s295_s2, [#allocation4]  }
 0x10a   :  { %225 = dma.done.wait [#allocation4], 128  }
 0x10b   :  { %226 = vsyncadd [#allocation4], 4294967168 }
 0x10c   :  { %130 = vsyncpa [#allocation3], 1 }
 0x10d   :  { %131 = vsyncpa [#allocation6], 1 }
 0x10e   :  { %132 = vsyncpa [#allocation4], 1 }

</bundles_post_ra>
